<compile_context>
chip_gen: v7x
topology: tpu7x:2x2x1
jax: 0.10.0
libtpu: 0.0.40
codegen_flags: <defaults>
</compile_context>

<pallas_src>
import functools

import jax
import jax.numpy as jnp
from jax.experimental import pallas as pl
from jax.experimental.pallas import tpu as pltpu

EPS = 1e-6              # pred clamp in RCE
LABEL_CLAMP_MIN = 1e-4  # one-hot clamp in RCE


def _round_up(x, m):
    return ((x + m - 1) // m) * m


def _nce_rce_kernel(pred_ref, labels_ref, out_ref, *,
                    alpha, beta, n_valid, c_valid, tile_n):
    pid = pl.program_id(0)
    nsteps = pl.num_programs(0)

    logits = pred_ref[...].astype(jnp.float32)   # (tile_n, c_pad)
    labels = labels_ref[...]                     # (tile_n, 1) int32
    tn, cp = logits.shape

    # masks: valid class lanes, target-class selector, valid batch rows
    class_ids = jax.lax.broadcasted_iota(jnp.int32, (tn, cp), 1)
    lane_mask = class_ids < c_valid                          # (tn, cp)
    sel = jnp.logical_and(class_ids == labels, lane_mask)    # one-hot as bool
    row_ids = jax.lax.broadcasted_iota(jnp.int32, (tn, 1), 0) + pid * tile_n
    row_mask = (row_ids < n_valid).astype(jnp.float32)       # (tn, 1)

    # --- masked softmax / log_softmax along the class axis ---
    zero = jnp.float32(0.0)
    neg_big = jnp.float32(-1e30)
    m = jnp.max(jnp.where(lane_mask, logits, neg_big), axis=1, keepdims=True)
    z = logits - m
    e = jnp.where(lane_mask, jnp.exp(z), zero)
    s = jnp.sum(e, axis=1, keepdims=True)
    inv_s = pl.reciprocal(s)                     # exact
    logp = z - jnp.log(s)                        # valid only where lane_mask
    p = jnp.where(lane_mask, jnp.clip(e * inv_s, EPS, 1.0), zero)

    # --- NCE: -sum(onehot * logp) / (-sum(logp)) per row ---
    nce_num = -jnp.sum(jnp.where(sel, logp, zero), axis=1, keepdims=True)
    nce_den = -jnp.sum(jnp.where(lane_mask, logp, zero), axis=1, keepdims=True)
    nce_per = nce_num * pl.reciprocal(nce_den)

    # --- RCE, simplified: -sum(p * log(clamp(onehot, 1e-4, 1)))
    #     = -log(1e-4) * (sum(p) - p_target) ---
    sum_p = jnp.sum(p, axis=1, keepdims=True)
    p_tgt = jnp.sum(jnp.where(sel, p, zero), axis=1, keepdims=True)
    rce_per = jnp.float32(-jnp.log(LABEL_CLAMP_MIN)) * (sum_p - p_tgt)

    per_row = (jnp.float32(alpha) * nce_per + jnp.float32(beta) * rce_per)
    tile_sum = jnp.sum(per_row * row_mask)

    # --- accumulate into the resident SMEM scalar output ---
    @pl.when(pid == 0)
    def _():
        out_ref[0, 0] = jnp.float32(0.0)

    out_ref[0, 0] += tile_sum

    @pl.when(pid == nsteps - 1)
    def _():
        out_ref[0, 0] = out_ref[0, 0] * jnp.float32(1.0 / n_valid)


def nce_and_rce_loss(pred, labels, *, alpha=1.0, beta=1.0, tile_n=None):
    """pred: (N, C) float logits; labels: (N,) int class ids -> scalar loss."""
    n, c = pred.shape

    # lane-dense class axis, sublane-aligned batch tiles
    c_pad = _round_up(max(c, 1), 128)
    if tile_n is None:
        tile_n = max(8, min(512, _round_up(n, 8)))
    else:
        tile_n = max(8, _round_up(int(tile_n), 8))
    n_pad = _round_up(n, tile_n)
    grid = (n_pad // tile_n,)

    pred_p = jnp.pad(pred, ((0, n_pad - n), (0, c_pad - c)))
    labels_p = jnp.pad(labels.astype(jnp.int32), (0, n_pad - n)).reshape(n_pad, 1)

    kernel = functools.partial(
        _nce_rce_kernel,
        alpha=float(alpha), beta=float(beta),
        n_valid=int(n), c_valid=int(c), tile_n=int(tile_n))

    out = pl.pallas_call(
        kernel,
        out_shape=jax.ShapeDtypeStruct((1, 1), jnp.float32),
        grid=grid,
        in_specs=[
            pl.BlockSpec((tile_n, c_pad), lambda i: (i, 0)),  # logits tile
            pl.BlockSpec((tile_n, 1), lambda i: (i, 0)),      # labels tile
        ],
        out_specs=pl.BlockSpec(memory_space=pltpu.MemorySpace.SMEM),
        compiler_params=pltpu.CompilerParams(
            dimension_semantics=("arbitrary",)),
    )(pred_p, labels_p)
    return out[0, 0]


def _reference(pred, labels, num_classes, alpha=1.0, beta=1.0):
    # pure-JAX reference mirroring the PyTorch module
    logp = jax.nn.log_softmax(pred.astype(jnp.float32), axis=1)
    oh = jax.nn.one_hot(labels, num_classes, dtype=jnp.float32)
    nce = -jnp.sum(oh * logp, axis=1) / (-jnp.sum(logp, axis=1))
    p = jnp.clip(jax.nn.softmax(pred.astype(jnp.float32), axis=1), EPS, 1.0)
    oh_c = jnp.clip(oh, LABEL_CLAMP_MIN, 1.0)
    rce = -jnp.sum(p * jnp.log(oh_c), axis=1)
    return alpha * jnp.mean(nce) + beta * jnp.mean(rce)


if __name__ == "__main__":
    key = jax.random.PRNGKey(0)
    k1, k2, k3, k4 = jax.random.split(key, 4)

    # small shape consistent with the module default (num_classes=10)
    batch, num_classes = 8, 10
    pred = jax.random.normal(k1, (batch, num_classes), dtype=jnp.float32)
    labels = jax.random.randint(k2, (batch,), 0, num_classes, dtype=jnp.int32)

    loss = nce_and_rce_loss(pred, labels, alpha=1.0, beta=1.0)
    jax.block_until_ready(loss)
    ref = _reference(pred, labels, num_classes)
    assert jnp.allclose(loss, ref, rtol=1e-5, atol=1e-5), (loss, ref)

    # second check: multi-tile grid with a partial last tile
    batch2 = 200
    pred2 = jax.random.normal(k3, (batch2, num_classes), dtype=jnp.float32)
    labels2 = jax.random.randint(k4, (batch2,), 0, num_classes, dtype=jnp.int32)
    loss2 = nce_and_rce_loss(pred2, labels2, alpha=1.0, beta=1.0, tile_n=64)
    jax.block_until_ready(loss2)
    ref2 = _reference(pred2, labels2, num_classes)
    assert jnp.allclose(loss2, ref2, rtol=1e-5, atol=1e-5), (loss2, ref2)

    print("KERNEL_OK")
</pallas_src>

<mosaic_0001>
module attributes {stable_mosaic.version = 11 : i64} {
  func.func @_nce_rce_kernel(%arg0: i32, %arg1: memref<8x128xf32, #tpu.memory_space<vmem>>, %arg2: memref<8x1xi32, #tpu.memory_space<vmem>>, %arg3: memref<1x1xf32, #tpu.memory_space<smem>>) attributes {dimension_semantics = [#tpu.dimension_semantics<arbitrary>], iteration_bounds = array<i64: 1>, scalar_prefetch = 0 : i64, scratch_operands = 0 : i64, tpu.core_type = #tpu.core_type<tc>, window_params = [{transform_indices = @transform_0, window_bounds = array<i64: 8, 128>}, {transform_indices = @transform_1, window_bounds = array<i64: 8, 1>}, {transform_indices = @transform_2, window_bounds = array<i64: 1, 1>}]} {
    %c0 = arith.constant 0 : index
    %c0_0 = arith.constant 0 : index
    %0 = vector.load %arg1[%c0, %c0_0] : memref<8x128xf32, #tpu.memory_space<vmem>>, vector<8x128xf32>
    %c0_1 = arith.constant 0 : index
    %c0_2 = arith.constant 0 : index
    %1 = vector.load %arg2[%c0_1, %c0_2] : memref<8x1xi32, #tpu.memory_space<vmem>>, vector<8x1xi32>
    %2 = tpu.iota {dimensions = array<i32: 1>} : vector<8x128xi32>
    %c10_i32 = arith.constant 10 : i32
    %3 = vector.broadcast %c10_i32 : i32 to vector<8x128xi32>
    %4 = arith.cmpi slt, %2, %3 : vector<8x128xi32>
    %5 = vector.broadcast %1 : vector<8x1xi32> to vector<8x128xi32>
    %6 = arith.cmpi eq, %2, %5 : vector<8x128xi32>
    %7 = arith.andi %6, %4 : vector<8x128xi1>
    %8 = tpu.iota {dimensions = array<i32: 0>} : vector<8x1xi32>
    %c8_i32 = arith.constant 8 : i32
    %9 = arith.muli %arg0, %c8_i32 : i32
    %10 = vector.broadcast %9 : i32 to vector<8x1xi32>
    %11 = arith.addi %8, %10 : vector<8x1xi32>
    %c8_i32_3 = arith.constant 8 : i32
    %12 = vector.broadcast %c8_i32_3 : i32 to vector<8x1xi32>
    %13 = arith.cmpi slt, %11, %12 : vector<8x1xi32>
    %14 = arith.extui %13 : vector<8x1xi1> to vector<8x1xi32>
    %15 = arith.sitofp %14 : vector<8x1xi32> to vector<8x1xf32>
    %cst = arith.constant -1.000000e+30 : f32
    %16 = vector.broadcast %cst : f32 to vector<8x128xf32>
    %17 = arith.select %4, %0, %16 : vector<8x128xi1>, vector<8x128xf32>
    %cst_4 = arith.constant dense<0xFF800000> : vector<8xf32>
    %18 = vector.multi_reduction <maximumf>, %17, %cst_4 [1] : vector<8x128xf32> to vector<8xf32>
    %19 = vector.shape_cast %18 : vector<8xf32> to vector<8x1xf32>
    %20 = vector.broadcast %19 : vector<8x1xf32> to vector<8x128xf32>
    %21 = arith.subf %0, %20 : vector<8x128xf32>
    %22 = math.exp %21 : vector<8x128xf32>
    %cst_5 = arith.constant 0.000000e+00 : f32
    %23 = vector.broadcast %cst_5 : f32 to vector<8x128xf32>
    %24 = arith.select %4, %22, %23 : vector<8x128xi1>, vector<8x128xf32>
    %cst_6 = arith.constant dense<0.000000e+00> : vector<8xf32>
    %25 = vector.multi_reduction <add>, %24, %cst_6 [1] : vector<8x128xf32> to vector<8xf32>
    %26 = vector.shape_cast %25 : vector<8xf32> to vector<8x1xf32>
    %27 = tpu.reciprocal %26 : vector<8x1xf32> -> vector<8x1xf32>
    %28 = math.log %26 : vector<8x1xf32>
    %29 = vector.broadcast %28 : vector<8x1xf32> to vector<8x128xf32>
    %30 = arith.subf %21, %29 : vector<8x128xf32>
    %31 = vector.broadcast %27 : vector<8x1xf32> to vector<8x128xf32>
    %32 = arith.mulf %24, %31 : vector<8x128xf32>
    %cst_7 = arith.constant 9.99999997E-7 : f32
    %cst_8 = arith.constant 1.000000e+00 : f32
    %33 = vector.broadcast %cst_7 : f32 to vector<8x128xf32>
    %34 = arith.maximumf %33, %32 : vector<8x128xf32>
    %35 = vector.broadcast %cst_8 : f32 to vector<8x128xf32>
    %36 = arith.minimumf %35, %34 : vector<8x128xf32>
    %cst_9 = arith.constant 0.000000e+00 : f32
    %37 = vector.broadcast %cst_9 : f32 to vector<8x128xf32>
    %38 = arith.select %4, %36, %37 : vector<8x128xi1>, vector<8x128xf32>
    %cst_10 = arith.constant 0.000000e+00 : f32
    %39 = vector.broadcast %cst_10 : f32 to vector<8x128xf32>
    %40 = arith.select %7, %30, %39 : vector<8x128xi1>, vector<8x128xf32>
    %cst_11 = arith.constant dense<0.000000e+00> : vector<8xf32>
    %41 = vector.multi_reduction <add>, %40, %cst_11 [1] : vector<8x128xf32> to vector<8xf32>
    %42 = vector.shape_cast %41 : vector<8xf32> to vector<8x1xf32>
    %cst_12 = arith.constant 0.000000e+00 : f32
    %43 = vector.broadcast %cst_12 : f32 to vector<8x1xf32>
    %44 = arith.subf %43, %42 : vector<8x1xf32>
    %cst_13 = arith.constant 0.000000e+00 : f32
    %45 = vector.broadcast %cst_13 : f32 to vector<8x128xf32>
    %46 = arith.select %4, %30, %45 : vector<8x128xi1>, vector<8x128xf32>
    %cst_14 = arith.constant dense<0.000000e+00> : vector<8xf32>
    %47 = vector.multi_reduction <add>, %46, %cst_14 [1] : vector<8x128xf32> to vector<8xf32>
    %48 = vector.shape_cast %47 : vector<8xf32> to vector<8x1xf32>
    %cst_15 = arith.constant 0.000000e+00 : f32
    %49 = vector.broadcast %cst_15 : f32 to vector<8x1xf32>
    %50 = arith.subf %49, %48 : vector<8x1xf32>
    %51 = tpu.reciprocal %50 : vector<8x1xf32> -> vector<8x1xf32>
    %52 = arith.mulf %44, %51 : vector<8x1xf32>
    %cst_16 = arith.constant dense<0.000000e+00> : vector<8xf32>
    %53 = vector.multi_reduction <add>, %38, %cst_16 [1] : vector<8x128xf32> to vector<8xf32>
    %54 = vector.shape_cast %53 : vector<8xf32> to vector<8x1xf32>
    %cst_17 = arith.constant 0.000000e+00 : f32
    %55 = vector.broadcast %cst_17 : f32 to vector<8x128xf32>
    %56 = arith.select %7, %38, %55 : vector<8x128xi1>, vector<8x128xf32>
    %cst_18 = arith.constant dense<0.000000e+00> : vector<8xf32>
    %57 = vector.multi_reduction <add>, %56, %cst_18 [1] : vector<8x128xf32> to vector<8xf32>
    %58 = vector.shape_cast %57 : vector<8xf32> to vector<8x1xf32>
    %cst_19 = arith.constant 9.99999974E-5 : f32
    %59 = math.log %cst_19 : f32
    %cst_20 = arith.constant 0.000000e+00 : f32
    %60 = arith.subf %cst_20, %59 : f32
    %61 = arith.subf %54, %58 : vector<8x1xf32>
    %62 = vector.broadcast %60 : f32 to vector<8x1xf32>
    %63 = arith.mulf %62, %61 : vector<8x1xf32>
    %cst_21 = arith.constant 1.000000e+00 : f32
    %64 = vector.broadcast %cst_21 : f32 to vector<8x1xf32>
    %65 = arith.mulf %64, %52 : vector<8x1xf32>
    %cst_22 = arith.constant 1.000000e+00 : f32
    %66 = vector.broadcast %cst_22 : f32 to vector<8x1xf32>
    %67 = arith.mulf %66, %63 : vector<8x1xf32>
    %68 = arith.addf %65, %67 : vector<8x1xf32>
    %69 = arith.mulf %68, %15 : vector<8x1xf32>
    %70 = vector.shape_cast %69 : vector<8x1xf32> to vector<1x8x1xf32>
    %cst_23 = arith.constant dense<0.000000e+00> : vector<1xf32>
    %71 = vector.multi_reduction <add>, %70, %cst_23 [1, 2] : vector<1x8x1xf32> to vector<1xf32>
    %72 = vector.shape_cast %71 : vector<1xf32> to vector<1x1x1xf32>
    %73 = vector.extract %72[0, 0, 0] : f32 from vector<1x1x1xf32>
    %c0_i32 = arith.constant 0 : i32
    %74 = arith.cmpi eq, %arg0, %c0_i32 : i32
    %75 = arith.extui %74 : i1 to i32
    %c0_i32_24 = arith.constant 0 : i32
    %76 = arith.cmpi ne, %75, %c0_i32_24 : i32
    scf.if %76 {
      %cst_31 = arith.constant 0.000000e+00 : f32
      %c0_32 = arith.constant 0 : index
      %c0_33 = arith.constant 0 : index
      %83 = memref.load %arg3[%c0_32, %c0_33] : memref<1x1xf32, #tpu.memory_space<smem>>
      memref.store %cst_31, %arg3[%c0_32, %c0_33] : memref<1x1xf32, #tpu.memory_space<smem>>
    } else {
    }
    %c0_25 = arith.constant 0 : index
    %c0_26 = arith.constant 0 : index
    %77 = memref.load %arg3[%c0_25, %c0_26] : memref<1x1xf32, #tpu.memory_space<smem>>
    %78 = arith.addf %77, %73 : f32
    %c0_27 = arith.constant 0 : index
    %c0_28 = arith.constant 0 : index
    %79 = memref.load %arg3[%c0_27, %c0_28] : memref<1x1xf32, #tpu.memory_space<smem>>
    memref.store %78, %arg3[%c0_27, %c0_28] : memref<1x1xf32, #tpu.memory_space<smem>>
    %c0_i32_29 = arith.constant 0 : i32
    %80 = arith.cmpi eq, %arg0, %c0_i32_29 : i32
    %81 = arith.extui %80 : i1 to i32
    %c0_i32_30 = arith.constant 0 : i32
    %82 = arith.cmpi ne, %81, %c0_i32_30 : i32
    scf.if %82 {
      %c0_31 = arith.constant 0 : index
      %c0_32 = arith.constant 0 : index
      %83 = memref.load %arg3[%c0_31, %c0_32] : memref<1x1xf32, #tpu.memory_space<smem>>
      %cst_33 = arith.constant 1.250000e-01 : f32
      %84 = arith.mulf %83, %cst_33 : f32
      %c0_34 = arith.constant 0 : index
      %c0_35 = arith.constant 0 : index
      %85 = memref.load %arg3[%c0_34, %c0_35] : memref<1x1xf32, #tpu.memory_space<smem>>
      memref.store %84, %arg3[%c0_34, %c0_35] : memref<1x1xf32, #tpu.memory_space<smem>>
    } else {
    }
    return
  }
  func.func @transform_0(%arg0: i32) -> (i32, i32) {
    %c0_i32 = arith.constant 0 : i32
    %c0_i32_0 = arith.constant 0 : i32
    return %arg0, %c0_i32 : i32, i32
  }
  func.func @transform_1(%arg0: i32) -> (i32, i32) {
    %c0_i32 = arith.constant 0 : i32
    %c0_i32_0 = arith.constant 0 : i32
    return %arg0, %c0_i32 : i32, i32
  }
  func.func @transform_2(%arg0: i32) -> (i32, i32) {
    %c0_i32 = arith.constant 0 : i32
    %c0_i32_0 = arith.constant 0 : i32
    %c0_i32_1 = arith.constant 0 : i32
    return %c0_i32, %c0_i32_0 : i32, i32
  }
}

</mosaic_0001>

<bundles_post_ra>
// kernel: tpu_custom_call.1
= control target key start
LH: loop header
LB: loop body
LE: loop exit
PB: predicated region body
PF: predicated region fallthrough
CT: control target
= control target key end

     0   :  { %v14_v0 = vlaneseq  ;;  %s173_s0 = inlined_call_operand.vmem [shape: f32[8,128], index: 0, kind: input, shape index: {}]   ;;  %s174_s1 = inlined_call_operand.vmem [shape: s32[8,1], index: 1, kind: input, shape index: {}]   ;;  %s175_s2 = inlined_call_operand.hbm [shape: f32[1,1], index: 2, kind: output, shape index: {}]  }
   0x1   :  { %7 = vsyncpa [#allocation3], 0  ;;  %v12_v1 = vld [vmem:[%s173_s0] sm:$0xff]  ;;  %v133_v5 = vmov 0   ;;  %vm66_vm3 = vcmask 7168   ;;  %s121_s15 = scalar_lea.hbm %s175_s2, 16 }
   0x2   :  { %v15_v2 = vand.u32 127, %v14_v0  ;;  %v13_v4 = vld [vmem:[%s174_s1] sm:$0xff]  ;;  %111 = vset.pattern.permute.xlu1 %v133_v5  ;;  %112 = vset.pattern.permute.xlu0 %v133_v5  ;;  %p122_p0 = scmp.ne.s32.totalorder %s175_s2, %s121_s15  ;;  %p125_p1 = scmp.lt.u32.totalorder %s121_s15, %s175_s2 }
   0x3   :  { %18 = vperm.xlu1 %111, %v13_v4  }
   0x4   :  { %vm16_vm0 = vcmp.lt.s32.totalorder %v15_v2, 10  ;;  %p127_p2 = pnand %p125_p1, %p122_p0 }
   0x5   :  { %v30_v3 = vsel %vm16_vm0, %v12_v1, -1e+30 }
   0x6   :  { %31 = vmax.xlane.f32.xlu0 %v30_v3 }
  0x82   :  { %v19_v12 = vpop.permute.xlu1 %18 }
  0x83   :  { %vm20_vm1 = vcmp.eq.s32.totalorder %v15_v2, %v19_v12 }
  0x84   :  { %vm21_vm2 = vmand %vm20_vm1, %vm16_vm0 }
  0x93   :  { %v32_v6 = vpop.xlane.xlu0 %31 }
  0x94   :  { %v33_v7 = vsub.f32 %v12_v1, %v32_v6 }
  0x96   :  { %v34_v8 = vmul.f32 1.442695, %v33_v7 }
  0x98   :  { %113 = vpow2.f32 %v34_v8 }
  0xa2   :  { %v114_v9 = vpop.eup %113 }
  0xa3   :  { %v36_v10 = vsel %vm16_vm0, %v114_v9, 0.0 }
  0xa4   :  { %37 = vadd.xlane.f32.xlu0 %v36_v10 }
 0x131   :  { %v38_v11 = vpop.xlane.xlu0 %37 }
 0x132   :  { %115 = vrcp.f32 %v38_v11 }
 0x133   :  { %117 = vlog2.f32 %v38_v11 }
 0x13c   :  { %v116_v13 = vpop.eup %115 }
 0x13d   :  { %v118_v14 = vpop.eup %117  ;;  %v43_v15 = vmul.f32 %v116_v13, %v36_v10 }
 0x13e   :  { %v41_v16 = vmul.f32 0.6931472, %v118_v14 }
 0x13f   :  { %v44_v17 = vmax.f32 %v43_v15, 1e-06 }
 0x140   :  { %v42_v18 = vsub.f32 %v33_v7, %v41_v16 }
 0x141   :  { %v45_v21 = vmin.f32 %v44_v17, 1.0 }
 0x142   :  { %v51_v19 = vsel %vm16_vm0, %v42_v18, 0.0  ;;  %v47_v20 = vsel %vm21_vm2, %v42_v18, 0.0 }
 0x143   :  { %52 = vadd.xlane.f32.xlu1 %v51_v19  ;;  %48 = vadd.xlane.f32.xlu0 %v47_v20  ;;  %v46_v22 = vsel %vm16_vm0, %v45_v21, 0.0 }
 0x144   :  { %v59_v23 = vsel %vm21_vm2, %v46_v22, 0.0 }
 0x147   :  { %57 = vadd.xlane.f32.xlu0 %v46_v22 }
 0x14b   :  { %60 = vadd.xlane.f32.xlu0 %v59_v23 }
 0x1d0   :  { %v53_v24 = vpop.xlane.xlu1 %52  ;;  %v49_v25 = vpop.xlane.xlu0 %48 }
 0x1d1   :  { %v54_v26 = vsub.f32 0.0, %v53_v24  ;;  %v50_v30 = vsub.f32 0.0, %v49_v25 }
 0x1d3   :  { %119 = vrcp.f32 %v54_v26 }
 0x1d4   :  { %v58_v27 = vpop.xlane.xlu0 %57 }
 0x1d8   :  { %v61_v28 = vpop.xlane.xlu0 %60 }
 0x1d9   :  { %v62_v29 = vsub.f32 %v58_v27, %v61_v28 }
 0x1db   :  { %v63_v33 = vmul.f32 9.2103405, %v62_v29 }
 0x1dd   :  { %v120_v31 = vpop.eup %119 }
 0x1de   :  { %v56_v32 = vmul.f32 %v120_v31, %v50_v30 }
 0x1e0   :  { %v64_v34 = vadd.f32 %v63_v33, %v56_v32 }
 0x1e2   :  { %v67_v35 = vsel %vm66_vm3, %v64_v34, 0.0 }
 0x1e3   :  { %68 = vadd.xlane.f32.xlu0 %v67_v35 }
 0x270   :  { %v69_v36 = vpop.xlane.xlu0 %68 }
 0x271   :  { %v70_v37 = vrot.slane %v69_v36, 4 }
 0x273   :  { %v71_v38 = vadd.f32 %v70_v37, %v69_v36 }
 0x275   :  { %v72_v39 = vrot.slane %v71_v38, 2 }
 0x277   :  { %v73_v40 = vadd.f32 %v72_v39, %v71_v38 }
 0x279   :  { %v74_v41 = vrot.slane %v73_v40, 1 }
 0x27b   :  { %v75_v42 = vadd.f32 %v74_v41, %v73_v40 }
 0x27d   :  { %106 = vpush %v75_v42 }
 0x2ae   :  { %s107_s0 = spop %106 }
 0x2af   :  { %s91_s1 = smul.f32 0.125, %s107_s0 }
 0x2b1   :  { %92 = sst [smem:[#allocation2]] %s91_s1 }
 0x2b2   :  { %130 = shalt.err (!%p127_p2)
}
 0x2b3   :  { %s134_s20 = smov [#allocation2]  }
 0x2b4   :  { %100 = dma.smem_to_hbm %s134_s20, 16, %s175_s2, [#allocation3]  }
 0x2b5   :  { %131 = dma.done.wait [#allocation3], 16  }
 0x2b6   :  { %132 = vsyncadd [#allocation3], 4294967280 }
 0x2b7   :  { %104 = sfence }
 0x2b8   :  { %105 = vsyncpa [#allocation3], 1 }

</bundles_post_ra>
